<compile_context>
chip_gen: v6e
topology: v6e:2x2x1
jax: 0.10.0
libtpu: 0.0.40
codegen_flags: <defaults>
</compile_context>

<pallas_src>
import functools

import jax
import jax.numpy as jnp
from jax import lax
from jax.experimental import pallas as pl
from jax.experimental.pallas import tpu as pltpu


BATCH_TILE = 8  # f32 sublane size; one batch tile per grid step.


def lstm_fused_kernel(words_ref, gx_tbl_ref, whh_ref, wlin_ref, blin_ref,
                      out_ref):
    # words_ref : (BB, T)   int32 token ids (batch tile, batch-major)
    # gx_tbl_ref: (Vp, 4H)  = Emb @ W_ih^T + (b_ih + b_hh), g-cols pre-scaled x2
    # whh_ref   : (H, 4H)   = W_hh^T, g-cols pre-scaled x2
    # wlin_ref  : (H, Vp)   = W_linear^T (vocab padded to lane size)
    # blin_ref  : (1, Vp)
    # out_ref   : (BB, Vp)
    BB, T = words_ref.shape
    Vp, G4 = gx_tbl_ref.shape
    H = whh_ref.shape[0]

    # --- Fused Embedding + input projection (+ bias) via one-hot MXU matmul.
    #     Time-major row order so per-step slices below are contiguous vregs.
    ids_tm = words_ref[...].T                                   # (T, BB)
    iota_v = lax.broadcasted_iota(jnp.int32, (T, BB, Vp), 2)
    onehot = (iota_v == ids_tm[:, :, None]).astype(jnp.float32)  # (T, BB, Vp)
    gx_all = jnp.dot(onehot.reshape(T * BB, Vp), gx_tbl_ref[...],
                     preferred_element_type=jnp.float32)         # (T*BB, 4H)

    whh = whh_ref[...]
    h = jnp.zeros((BB, H), jnp.float32)
    c = jnp.zeros((BB, H), jnp.float32)

    # --- Fully-unrolled recurrence (T is a small static trip count).
    # TODO(synk): for T >~ 32, switch to lax.fori_loop(unroll=2-4) reading the
    # per-step gx slab from a VMEM scratch to avoid vreg spills.
    for t in range(T):
        gates = gx_all[t * BB:(t + 1) * BB, :] + jnp.dot(
            h, whh, preferred_element_type=jnp.float32)          # (BB, 4H)
        # Single full-vreg sigmoid; tanh of the g gate is derived from it
        # because its pre-activation columns were pre-scaled by 2:
        #   tanh(z) = 2 * sigmoid(2 z) - 1.
        s = jax.nn.sigmoid(gates)
        i_g = s[:, 0:H]
        f_g = s[:, H:2 * H]
        g_g = 2.0 * s[:, 2 * H:3 * H] - 1.0
        o_g = s[:, 3 * H:4 * H]
        c = f_g * c + i_g * g_g
        h = o_g * jnp.tanh(c)

    # --- Final linear on the last hidden state; lane-dense (BB, Vp) store.
    out_ref[...] = (jnp.dot(h, wlin_ref[...],
                            preferred_element_type=jnp.float32)
                    + blin_ref[...])


def prepare_params(params):
    """One-time parameter preparation (all layout work hoisted out of the
    per-call path)."""
    emb = params["embedding"].astype(jnp.float32)        # (V, E)
    w_ih = params["w_ih"].astype(jnp.float32)            # (4H, E)
    w_hh = params["w_hh"].astype(jnp.float32)            # (4H, H)
    bias = (params["b_ih"] + params["b_hh"]).astype(jnp.float32)  # (4H,)
    w_lin = params["w_lin"].astype(jnp.float32)          # (V, H)
    b_lin = params["b_lin"].astype(jnp.float32)          # (V,)

    V, _E = emb.shape
    H = w_hh.shape[1]
    Vp = max(128, ((V + 127) // 128) * 128)

    # Fuse Embedding with the LSTM input projection and fold in both biases.
    gx_table = emb @ w_ih.T + bias                       # (V, 4H)

    # Pre-scale the g-gate (cell candidate) columns by 2 so the kernel can
    # recover tanh(g) from a single sigmoid over the whole gate vreg.
    col_scale = jnp.concatenate([
        jnp.ones((2 * H,), jnp.float32),
        jnp.full((H,), 2.0, jnp.float32),
        jnp.ones((H,), jnp.float32),
    ])
    gx_table = gx_table * col_scale
    whh_t = w_hh.T * col_scale                           # (H, 4H)

    # Pad the vocab axis to the lane size once, offline.
    gx_table = jnp.pad(gx_table, ((0, Vp - V), (0, 0)))  # (Vp, 4H)
    w_lin_t = jnp.pad(w_lin.T, ((0, 0), (0, Vp - V)))    # (H, Vp)
    b_lin_p = jnp.pad(b_lin, (0, Vp - V))[None, :]       # (1, Vp)

    # TODO(synk): optionally store gx_table / whh_t / w_lin_t in bf16 (keeping
    # f32 accumulation) to halve MXU pass cost on v6e/v7x at larger H.
    return {
        "gx_table": gx_table,
        "whh_t": whh_t,
        "w_lin_t": w_lin_t,
        "b_lin": b_lin_p,
        "vocab": int(V),
    }


@functools.partial(jax.jit, static_argnums=(5,))
def _forward_impl(words, gx_table, whh_t, w_lin_t, b_lin, vocab):
    B, T = words.shape
    Vp, G4 = gx_table.shape
    H = whh_t.shape[0]

    BB = BATCH_TILE
    B_pad = max(BB, ((B + BB - 1) // BB) * BB)
    words_p = words
    if B_pad != B:
        words_p = jnp.pad(words, ((0, B_pad - B), (0, 0)))   # padded ids -> 0

    out = pl.pallas_call(
        lstm_fused_kernel,
        out_shape=jax.ShapeDtypeStruct((B_pad, Vp), jnp.float32),
        grid=(B_pad // BB,),
        in_specs=[
            pl.BlockSpec((BB, T), lambda b: (b, 0)),      # token ids
            pl.BlockSpec((Vp, G4), lambda b: (0, 0)),     # fused emb/W_ih table
            pl.BlockSpec((H, G4), lambda b: (0, 0)),      # W_hh^T
            pl.BlockSpec((H, Vp), lambda b: (0, 0)),      # W_lin^T
            pl.BlockSpec((1, Vp), lambda b: (0, 0)),      # b_lin
        ],
        out_specs=pl.BlockSpec((BB, Vp), lambda b: (b, 0)),
        compiler_params=pltpu.CompilerParams(
            dimension_semantics=("parallel",)),
        # TODO(synk): for a word-level vocab (Vp in the tens of thousands),
        # add a grid axis tiling Vp for the final linear / output and raise
        # vmem_limit_bytes (v7x has only 64 MiB physical VMEM).
    )(words_p, gx_table, whh_t, w_lin_t, b_lin)

    return out[:B, :vocab]


def shakespeare_lstm_forward(words, prepared):
    """words: (B, T) int32 token ids -> (B, V) logits."""
    return _forward_impl(words.astype(jnp.int32),
                         prepared["gx_table"], prepared["whh_t"],
                         prepared["w_lin_t"], prepared["b_lin"],
                         prepared["vocab"])


def _reference_forward(words, params):
    """Pure-JAX reference of the PyTorch forward (for a sanity check)."""
    emb = jnp.take(params["embedding"], words, axis=0)  # (B, T, E)
    H = params["w_hh"].shape[1]
    wih_t = params["w_ih"].T
    whh_t = params["w_hh"].T
    b = params["b_ih"] + params["b_hh"]

    def step(carry, x_t):
        h, c = carry
        gates = x_t @ wih_t + h @ whh_t + b
        i = jax.nn.sigmoid(gates[:, 0:H])
        f = jax.nn.sigmoid(gates[:, H:2 * H])
        g = jnp.tanh(gates[:, 2 * H:3 * H])
        o = jax.nn.sigmoid(gates[:, 3 * H:4 * H])
        c = f * c + i * g
        h = o * jnp.tanh(c)
        return (h, c), None

    B = words.shape[0]
    h0 = jnp.zeros((B, H), jnp.float32)
    c0 = jnp.zeros((B, H), jnp.float32)
    (h_last, _), _ = lax.scan(step, (h0, c0),
                              jnp.transpose(emb, (1, 0, 2)))
    return h_last @ params["w_lin"].T + params["b_lin"]


def init_params(key, vocab, emb_dim, hidden):
    ks = jax.random.split(key, 7)
    scale = 1.0 / jnp.sqrt(hidden)
    return {
        "embedding": jax.random.normal(ks[0], (vocab, emb_dim), jnp.float32),
        "w_ih": jax.random.uniform(ks[1], (4 * hidden, emb_dim), jnp.float32,
                                   -scale, scale),
        "w_hh": jax.random.uniform(ks[2], (4 * hidden, hidden), jnp.float32,
                                   -scale, scale),
        "b_ih": jax.random.uniform(ks[3], (4 * hidden,), jnp.float32,
                                   -scale, scale),
        "b_hh": jax.random.uniform(ks[4], (4 * hidden,), jnp.float32,
                                   -scale, scale),
        "w_lin": jax.random.uniform(ks[5], (vocab, hidden), jnp.float32,
                                    -scale, scale),
        "b_lin": jax.random.uniform(ks[6], (vocab,), jnp.float32,
                                    -scale, scale),
    }


if __name__ == "__main__":
    VOCAB, EMB, HIDDEN = 64, 32, 32
    BATCH, SEQ = 4, 8

    key = jax.random.PRNGKey(0)
    pkey, wkey = jax.random.split(key)
    params = init_params(pkey, VOCAB, EMB, HIDDEN)
    prepared = prepare_params(params)        # one-time layout / fusion work
    words = jax.random.randint(wkey, (BATCH, SEQ), 0, VOCAB, dtype=jnp.int32)

    out = shakespeare_lstm_forward(words, prepared)
    out = jax.block_until_ready(out)

    ref = _reference_forward(words, params)
    assert out.shape == (BATCH, VOCAB)
    assert jnp.allclose(out, ref, atol=1e-4, rtol=1e-4), (
        float(jnp.max(jnp.abs(out - ref))))

    print("KERNEL_OK")
</pallas_src>

<mosaic_0001>
module attributes {stable_mosaic.version = 11 : i64} {
  func.func @lstm_fused_kernel(%arg0: i32, %arg1: memref<8x8xi32, #tpu.memory_space<vmem>>, %arg2: memref<128x128xf32, #tpu.memory_space<vmem>>, %arg3: memref<32x128xf32, #tpu.memory_space<vmem>>, %arg4: memref<32x128xf32, #tpu.memory_space<vmem>>, %arg5: memref<1x128xf32, #tpu.memory_space<vmem>>, %arg6: memref<8x128xf32, #tpu.memory_space<vmem>>) attributes {dimension_semantics = [#tpu.dimension_semantics<parallel>], iteration_bounds = array<i64: 1>, scalar_prefetch = 0 : i64, scratch_operands = 0 : i64, tpu.core_type = #tpu.core_type<tc>, window_params = [{transform_indices = @transform_0, window_bounds = array<i64: 8, 8>}, {pipeline_mode = #tpu.pipeline_mode<synchronous>, transform_indices = @transform_1, window_bounds = array<i64: 128, 128>}, {pipeline_mode = #tpu.pipeline_mode<synchronous>, transform_indices = @transform_2, window_bounds = array<i64: 32, 128>}, {pipeline_mode = #tpu.pipeline_mode<synchronous>, transform_indices = @transform_3, window_bounds = array<i64: 32, 128>}, {pipeline_mode = #tpu.pipeline_mode<synchronous>, transform_indices = @transform_4, window_bounds = array<i64: 1, 128>}, {transform_indices = @transform_5, window_bounds = array<i64: 8, 128>}]} {
    %c0 = arith.constant 0 : index
    %c0_0 = arith.constant 0 : index
    %0 = vector.load %arg1[%c0, %c0_0] : memref<8x8xi32, #tpu.memory_space<vmem>>, vector<8x8xi32>
    %1 = tpu.transpose %0, [1, 0] : vector<8x8xi32> -> vector<8x8xi32>
    %2 = tpu.iota {dimensions = array<i32: 2>} : vector<8x8x128xi32>
    %3 = vector.shape_cast %1 : vector<8x8xi32> to vector<8x8x1xi32>
    %4 = vector.broadcast %3 : vector<8x8x1xi32> to vector<8x8x128xi32>
    %5 = arith.cmpi eq, %2, %4 : vector<8x8x128xi32>
    %6 = arith.extui %5 : vector<8x8x128xi1> to vector<8x8x128xi32>
    %7 = arith.sitofp %6 : vector<8x8x128xi32> to vector<8x8x128xf32>
    %8 = vector.shape_cast %7 : vector<8x8x128xf32> to vector<64x128xf32>
    %c0_1 = arith.constant 0 : index
    %c0_2 = arith.constant 0 : index
    %9 = vector.load %arg2[%c0_1, %c0_2] : memref<128x128xf32, #tpu.memory_space<vmem>>, vector<128x128xf32>
    %cst = arith.constant dense<0.000000e+00> : vector<64x128xf32>
    %10 = tpu.matmul %8, %9, %cst {dimension_numbers = #tpu.dot_dimension_numbers<[1], [0], [0], [1], [0, 0, 1, 1], [], []>} : vector<64x128xf32>, vector<128x128xf32>, vector<64x128xf32> -> vector<64x128xf32>
    %c0_3 = arith.constant 0 : index
    %c0_4 = arith.constant 0 : index
    %11 = vector.load %arg3[%c0_3, %c0_4] : memref<32x128xf32, #tpu.memory_space<vmem>>, vector<32x128xf32>
    %cst_5 = arith.constant 0.000000e+00 : f32
    %12 = vector.broadcast %cst_5 : f32 to vector<8x32xf32>
    %cst_6 = arith.constant 0.000000e+00 : f32
    %13 = vector.broadcast %cst_6 : f32 to vector<8x32xf32>
    %14 = vector.extract_strided_slice %10 {offsets = [0, 0], sizes = [8, 128], strides = [1, 1]} : vector<64x128xf32> to vector<8x128xf32>
    %cst_7 = arith.constant dense<0.000000e+00> : vector<8x128xf32>
    %15 = tpu.matmul %12, %11, %cst_7 {dimension_numbers = #tpu.dot_dimension_numbers<[1], [0], [0], [1], [0, 0, 1, 1], [], []>} : vector<8x32xf32>, vector<32x128xf32>, vector<8x128xf32> -> vector<8x128xf32>
    %16 = arith.addf %14, %15 : vector<8x128xf32>
    %17 = arith.negf %16 : vector<8x128xf32>
    %18 = math.exp %17 : vector<8x128xf32>
    %cst_8 = arith.constant 1.000000e+00 : f32
    %19 = vector.broadcast %cst_8 : f32 to vector<8x128xf32>
    %20 = arith.addf %19, %18 : vector<8x128xf32>
    %21 = arith.divf %19, %20 : vector<8x128xf32>
    %22 = vector.extract_strided_slice %21 {offsets = [0, 0], sizes = [8, 32], strides = [1, 1]} : vector<8x128xf32> to vector<8x32xf32>
    %23 = vector.extract_strided_slice %21 {offsets = [0, 32], sizes = [8, 32], strides = [1, 1]} : vector<8x128xf32> to vector<8x32xf32>
    %24 = vector.extract_strided_slice %21 {offsets = [0, 64], sizes = [8, 32], strides = [1, 1]} : vector<8x128xf32> to vector<8x32xf32>
    %cst_9 = arith.constant 2.000000e+00 : f32
    %25 = vector.broadcast %cst_9 : f32 to vector<8x32xf32>
    %26 = arith.mulf %25, %24 : vector<8x32xf32>
    %cst_10 = arith.constant 1.000000e+00 : f32
    %27 = vector.broadcast %cst_10 : f32 to vector<8x32xf32>
    %28 = arith.subf %26, %27 : vector<8x32xf32>
    %29 = vector.extract_strided_slice %21 {offsets = [0, 96], sizes = [8, 32], strides = [1, 1]} : vector<8x128xf32> to vector<8x32xf32>
    %30 = arith.mulf %23, %13 : vector<8x32xf32>
    %31 = arith.mulf %22, %28 : vector<8x32xf32>
    %32 = arith.addf %30, %31 : vector<8x32xf32>
    %33 = math.tanh %32 : vector<8x32xf32>
    %34 = arith.mulf %29, %33 : vector<8x32xf32>
    %35 = vector.extract_strided_slice %10 {offsets = [8, 0], sizes = [8, 128], strides = [1, 1]} : vector<64x128xf32> to vector<8x128xf32>
    %cst_11 = arith.constant dense<0.000000e+00> : vector<8x128xf32>
    %36 = tpu.matmul %34, %11, %cst_11 {dimension_numbers = #tpu.dot_dimension_numbers<[1], [0], [0], [1], [0, 0, 1, 1], [], []>} : vector<8x32xf32>, vector<32x128xf32>, vector<8x128xf32> -> vector<8x128xf32>
    %37 = arith.addf %35, %36 : vector<8x128xf32>
    %38 = arith.negf %37 : vector<8x128xf32>
    %39 = math.exp %38 : vector<8x128xf32>
    %cst_12 = arith.constant 1.000000e+00 : f32
    %40 = vector.broadcast %cst_12 : f32 to vector<8x128xf32>
    %41 = arith.addf %40, %39 : vector<8x128xf32>
    %42 = arith.divf %40, %41 : vector<8x128xf32>
    %43 = vector.extract_strided_slice %42 {offsets = [0, 0], sizes = [8, 32], strides = [1, 1]} : vector<8x128xf32> to vector<8x32xf32>
    %44 = vector.extract_strided_slice %42 {offsets = [0, 32], sizes = [8, 32], strides = [1, 1]} : vector<8x128xf32> to vector<8x32xf32>
    %45 = vector.extract_strided_slice %42 {offsets = [0, 64], sizes = [8, 32], strides = [1, 1]} : vector<8x128xf32> to vector<8x32xf32>
    %cst_13 = arith.constant 2.000000e+00 : f32
    %46 = vector.broadcast %cst_13 : f32 to vector<8x32xf32>
    %47 = arith.mulf %46, %45 : vector<8x32xf32>
    %cst_14 = arith.constant 1.000000e+00 : f32
    %48 = vector.broadcast %cst_14 : f32 to vector<8x32xf32>
    %49 = arith.subf %47, %48 : vector<8x32xf32>
    %50 = vector.extract_strided_slice %42 {offsets = [0, 96], sizes = [8, 32], strides = [1, 1]} : vector<8x128xf32> to vector<8x32xf32>
    %51 = arith.mulf %44, %32 : vector<8x32xf32>
    %52 = arith.mulf %43, %49 : vector<8x32xf32>
    %53 = arith.addf %51, %52 : vector<8x32xf32>
    %54 = math.tanh %53 : vector<8x32xf32>
    %55 = arith.mulf %50, %54 : vector<8x32xf32>
    %56 = vector.extract_strided_slice %10 {offsets = [16, 0], sizes = [8, 128], strides = [1, 1]} : vector<64x128xf32> to vector<8x128xf32>
    %cst_15 = arith.constant dense<0.000000e+00> : vector<8x128xf32>
    %57 = tpu.matmul %55, %11, %cst_15 {dimension_numbers = #tpu.dot_dimension_numbers<[1], [0], [0], [1], [0, 0, 1, 1], [], []>} : vector<8x32xf32>, vector<32x128xf32>, vector<8x128xf32> -> vector<8x128xf32>
    %58 = arith.addf %56, %57 : vector<8x128xf32>
    %59 = arith.negf %58 : vector<8x128xf32>
    %60 = math.exp %59 : vector<8x128xf32>
    %cst_16 = arith.constant 1.000000e+00 : f32
    %61 = vector.broadcast %cst_16 : f32 to vector<8x128xf32>
    %62 = arith.addf %61, %60 : vector<8x128xf32>
    %63 = arith.divf %61, %62 : vector<8x128xf32>
    %64 = vector.extract_strided_slice %63 {offsets = [0, 0], sizes = [8, 32], strides = [1, 1]} : vector<8x128xf32> to vector<8x32xf32>
    %65 = vector.extract_strided_slice %63 {offsets = [0, 32], sizes = [8, 32], strides = [1, 1]} : vector<8x128xf32> to vector<8x32xf32>
    %66 = vector.extract_strided_slice %63 {offsets = [0, 64], sizes = [8, 32], strides = [1, 1]} : vector<8x128xf32> to vector<8x32xf32>
    %cst_17 = arith.constant 2.000000e+00 : f32
    %67 = vector.broadcast %cst_17 : f32 to vector<8x32xf32>
    %68 = arith.mulf %67, %66 : vector<8x32xf32>
    %cst_18 = arith.constant 1.000000e+00 : f32
    %69 = vector.broadcast %cst_18 : f32 to vector<8x32xf32>
    %70 = arith.subf %68, %69 : vector<8x32xf32>
    %71 = vector.extract_strided_slice %63 {offsets = [0, 96], sizes = [8, 32], strides = [1, 1]} : vector<8x128xf32> to vector<8x32xf32>
    %72 = arith.mulf %65, %53 : vector<8x32xf32>
    %73 = arith.mulf %64, %70 : vector<8x32xf32>
    %74 = arith.addf %72, %73 : vector<8x32xf32>
    %75 = math.tanh %74 : vector<8x32xf32>
    %76 = arith.mulf %71, %75 : vector<8x32xf32>
    %77 = vector.extract_strided_slice %10 {offsets = [24, 0], sizes = [8, 128], strides = [1, 1]} : vector<64x128xf32> to vector<8x128xf32>
    %cst_19 = arith.constant dense<0.000000e+00> : vector<8x128xf32>
    %78 = tpu.matmul %76, %11, %cst_19 {dimension_numbers = #tpu.dot_dimension_numbers<[1], [0], [0], [1], [0, 0, 1, 1], [], []>} : vector<8x32xf32>, vector<32x128xf32>, vector<8x128xf32> -> vector<8x128xf32>
    %79 = arith.addf %77, %78 : vector<8x128xf32>
    %80 = arith.negf %79 : vector<8x128xf32>
    %81 = math.exp %80 : vector<8x128xf32>
    %cst_20 = arith.constant 1.000000e+00 : f32
    %82 = vector.broadcast %cst_20 : f32 to vector<8x128xf32>
    %83 = arith.addf %82, %81 : vector<8x128xf32>
    %84 = arith.divf %82, %83 : vector<8x128xf32>
    %85 = vector.extract_strided_slice %84 {offsets = [0, 0], sizes = [8, 32], strides = [1, 1]} : vector<8x128xf32> to vector<8x32xf32>
    %86 = vector.extract_strided_slice %84 {offsets = [0, 32], sizes = [8, 32], strides = [1, 1]} : vector<8x128xf32> to vector<8x32xf32>
    %87 = vector.extract_strided_slice %84 {offsets = [0, 64], sizes = [8, 32], strides = [1, 1]} : vector<8x128xf32> to vector<8x32xf32>
    %cst_21 = arith.constant 2.000000e+00 : f32
    %88 = vector.broadcast %cst_21 : f32 to vector<8x32xf32>
    %89 = arith.mulf %88, %87 : vector<8x32xf32>
    %cst_22 = arith.constant 1.000000e+00 : f32
    %90 = vector.broadcast %cst_22 : f32 to vector<8x32xf32>
    %91 = arith.subf %89, %90 : vector<8x32xf32>
    %92 = vector.extract_strided_slice %84 {offsets = [0, 96], sizes = [8, 32], strides = [1, 1]} : vector<8x128xf32> to vector<8x32xf32>
    %93 = arith.mulf %86, %74 : vector<8x32xf32>
    %94 = arith.mulf %85, %91 : vector<8x32xf32>
    %95 = arith.addf %93, %94 : vector<8x32xf32>
    %96 = math.tanh %95 : vector<8x32xf32>
    %97 = arith.mulf %92, %96 : vector<8x32xf32>
    %98 = vector.extract_strided_slice %10 {offsets = [32, 0], sizes = [8, 128], strides = [1, 1]} : vector<64x128xf32> to vector<8x128xf32>
    %cst_23 = arith.constant dense<0.000000e+00> : vector<8x128xf32>
    %99 = tpu.matmul %97, %11, %cst_23 {dimension_numbers = #tpu.dot_dimension_numbers<[1], [0], [0], [1], [0, 0, 1, 1], [], []>} : vector<8x32xf32>, vector<32x128xf32>, vector<8x128xf32> -> vector<8x128xf32>
    %100 = arith.addf %98, %99 : vector<8x128xf32>
    %101 = arith.negf %100 : vector<8x128xf32>
    %102 = math.exp %101 : vector<8x128xf32>
    %cst_24 = arith.constant 1.000000e+00 : f32
    %103 = vector.broadcast %cst_24 : f32 to vector<8x128xf32>
    %104 = arith.addf %103, %102 : vector<8x128xf32>
    %105 = arith.divf %103, %104 : vector<8x128xf32>
    %106 = vector.extract_strided_slice %105 {offsets = [0, 0], sizes = [8, 32], strides = [1, 1]} : vector<8x128xf32> to vector<8x32xf32>
    %107 = vector.extract_strided_slice %105 {offsets = [0, 32], sizes = [8, 32], strides = [1, 1]} : vector<8x128xf32> to vector<8x32xf32>
    %108 = vector.extract_strided_slice %105 {offsets = [0, 64], sizes = [8, 32], strides = [1, 1]} : vector<8x128xf32> to vector<8x32xf32>
    %cst_25 = arith.constant 2.000000e+00 : f32
    %109 = vector.broadcast %cst_25 : f32 to vector<8x32xf32>
    %110 = arith.mulf %109, %108 : vector<8x32xf32>
    %cst_26 = arith.constant 1.000000e+00 : f32
    %111 = vector.broadcast %cst_26 : f32 to vector<8x32xf32>
    %112 = arith.subf %110, %111 : vector<8x32xf32>
    %113 = vector.extract_strided_slice %105 {offsets = [0, 96], sizes = [8, 32], strides = [1, 1]} : vector<8x128xf32> to vector<8x32xf32>
    %114 = arith.mulf %107, %95 : vector<8x32xf32>
    %115 = arith.mulf %106, %112 : vector<8x32xf32>
    %116 = arith.addf %114, %115 : vector<8x32xf32>
    %117 = math.tanh %116 : vector<8x32xf32>
    %118 = arith.mulf %113, %117 : vector<8x32xf32>
    %119 = vector.extract_strided_slice %10 {offsets = [40, 0], sizes = [8, 128], strides = [1, 1]} : vector<64x128xf32> to vector<8x128xf32>
    %cst_27 = arith.constant dense<0.000000e+00> : vector<8x128xf32>
    %120 = tpu.matmul %118, %11, %cst_27 {dimension_numbers = #tpu.dot_dimension_numbers<[1], [0], [0], [1], [0, 0, 1, 1], [], []>} : vector<8x32xf32>, vector<32x128xf32>, vector<8x128xf32> -> vector<8x128xf32>
    %121 = arith.addf %119, %120 : vector<8x128xf32>
    %122 = arith.negf %121 : vector<8x128xf32>
    %123 = math.exp %122 : vector<8x128xf32>
    %cst_28 = arith.constant 1.000000e+00 : f32
    %124 = vector.broadcast %cst_28 : f32 to vector<8x128xf32>
    %125 = arith.addf %124, %123 : vector<8x128xf32>
    %126 = arith.divf %124, %125 : vector<8x128xf32>
    %127 = vector.extract_strided_slice %126 {offsets = [0, 0], sizes = [8, 32], strides = [1, 1]} : vector<8x128xf32> to vector<8x32xf32>
    %128 = vector.extract_strided_slice %126 {offsets = [0, 32], sizes = [8, 32], strides = [1, 1]} : vector<8x128xf32> to vector<8x32xf32>
    %129 = vector.extract_strided_slice %126 {offsets = [0, 64], sizes = [8, 32], strides = [1, 1]} : vector<8x128xf32> to vector<8x32xf32>
    %cst_29 = arith.constant 2.000000e+00 : f32
    %130 = vector.broadcast %cst_29 : f32 to vector<8x32xf32>
    %131 = arith.mulf %130, %129 : vector<8x32xf32>
    %cst_30 = arith.constant 1.000000e+00 : f32
    %132 = vector.broadcast %cst_30 : f32 to vector<8x32xf32>
    %133 = arith.subf %131, %132 : vector<8x32xf32>
    %134 = vector.extract_strided_slice %126 {offsets = [0, 96], sizes = [8, 32], strides = [1, 1]} : vector<8x128xf32> to vector<8x32xf32>
    %135 = arith.mulf %128, %116 : vector<8x32xf32>
    %136 = arith.mulf %127, %133 : vector<8x32xf32>
    %137 = arith.addf %135, %136 : vector<8x32xf32>
    %138 = math.tanh %137 : vector<8x32xf32>
    %139 = arith.mulf %134, %138 : vector<8x32xf32>
    %140 = vector.extract_strided_slice %10 {offsets = [48, 0], sizes = [8, 128], strides = [1, 1]} : vector<64x128xf32> to vector<8x128xf32>
    %cst_31 = arith.constant dense<0.000000e+00> : vector<8x128xf32>
    %141 = tpu.matmul %139, %11, %cst_31 {dimension_numbers = #tpu.dot_dimension_numbers<[1], [0], [0], [1], [0, 0, 1, 1], [], []>} : vector<8x32xf32>, vector<32x128xf32>, vector<8x128xf32> -> vector<8x128xf32>
    %142 = arith.addf %140, %141 : vector<8x128xf32>
    %143 = arith.negf %142 : vector<8x128xf32>
    %144 = math.exp %143 : vector<8x128xf32>
    %cst_32 = arith.constant 1.000000e+00 : f32
    %145 = vector.broadcast %cst_32 : f32 to vector<8x128xf32>
    %146 = arith.addf %145, %144 : vector<8x128xf32>
    %147 = arith.divf %145, %146 : vector<8x128xf32>
    %148 = vector.extract_strided_slice %147 {offsets = [0, 0], sizes = [8, 32], strides = [1, 1]} : vector<8x128xf32> to vector<8x32xf32>
    %149 = vector.extract_strided_slice %147 {offsets = [0, 32], sizes = [8, 32], strides = [1, 1]} : vector<8x128xf32> to vector<8x32xf32>
    %150 = vector.extract_strided_slice %147 {offsets = [0, 64], sizes = [8, 32], strides = [1, 1]} : vector<8x128xf32> to vector<8x32xf32>
    %cst_33 = arith.constant 2.000000e+00 : f32
    %151 = vector.broadcast %cst_33 : f32 to vector<8x32xf32>
    %152 = arith.mulf %151, %150 : vector<8x32xf32>
    %cst_34 = arith.constant 1.000000e+00 : f32
    %153 = vector.broadcast %cst_34 : f32 to vector<8x32xf32>
    %154 = arith.subf %152, %153 : vector<8x32xf32>
    %155 = vector.extract_strided_slice %147 {offsets = [0, 96], sizes = [8, 32], strides = [1, 1]} : vector<8x128xf32> to vector<8x32xf32>
    %156 = arith.mulf %149, %137 : vector<8x32xf32>
    %157 = arith.mulf %148, %154 : vector<8x32xf32>
    %158 = arith.addf %156, %157 : vector<8x32xf32>
    %159 = math.tanh %158 : vector<8x32xf32>
    %160 = arith.mulf %155, %159 : vector<8x32xf32>
    %161 = vector.extract_strided_slice %10 {offsets = [56, 0], sizes = [8, 128], strides = [1, 1]} : vector<64x128xf32> to vector<8x128xf32>
    %cst_35 = arith.constant dense<0.000000e+00> : vector<8x128xf32>
    %162 = tpu.matmul %160, %11, %cst_35 {dimension_numbers = #tpu.dot_dimension_numbers<[1], [0], [0], [1], [0, 0, 1, 1], [], []>} : vector<8x32xf32>, vector<32x128xf32>, vector<8x128xf32> -> vector<8x128xf32>
    %163 = arith.addf %161, %162 : vector<8x128xf32>
    %164 = arith.negf %163 : vector<8x128xf32>
    %165 = math.exp %164 : vector<8x128xf32>
    %cst_36 = arith.constant 1.000000e+00 : f32
    %166 = vector.broadcast %cst_36 : f32 to vector<8x128xf32>
    %167 = arith.addf %166, %165 : vector<8x128xf32>
    %168 = arith.divf %166, %167 : vector<8x128xf32>
    %169 = vector.extract_strided_slice %168 {offsets = [0, 0], sizes = [8, 32], strides = [1, 1]} : vector<8x128xf32> to vector<8x32xf32>
    %170 = vector.extract_strided_slice %168 {offsets = [0, 32], sizes = [8, 32], strides = [1, 1]} : vector<8x128xf32> to vector<8x32xf32>
    %171 = vector.extract_strided_slice %168 {offsets = [0, 64], sizes = [8, 32], strides = [1, 1]} : vector<8x128xf32> to vector<8x32xf32>
    %cst_37 = arith.constant 2.000000e+00 : f32
    %172 = vector.broadcast %cst_37 : f32 to vector<8x32xf32>
    %173 = arith.mulf %172, %171 : vector<8x32xf32>
    %cst_38 = arith.constant 1.000000e+00 : f32
    %174 = vector.broadcast %cst_38 : f32 to vector<8x32xf32>
    %175 = arith.subf %173, %174 : vector<8x32xf32>
    %176 = vector.extract_strided_slice %168 {offsets = [0, 96], sizes = [8, 32], strides = [1, 1]} : vector<8x128xf32> to vector<8x32xf32>
    %177 = arith.mulf %170, %158 : vector<8x32xf32>
    %178 = arith.mulf %169, %175 : vector<8x32xf32>
    %179 = arith.addf %177, %178 : vector<8x32xf32>
    %180 = math.tanh %179 : vector<8x32xf32>
    %181 = arith.mulf %176, %180 : vector<8x32xf32>
    %c0_39 = arith.constant 0 : index
    %c0_40 = arith.constant 0 : index
    %182 = vector.load %arg4[%c0_39, %c0_40] : memref<32x128xf32, #tpu.memory_space<vmem>>, vector<32x128xf32>
    %cst_41 = arith.constant dense<0.000000e+00> : vector<8x128xf32>
    %183 = tpu.matmul %181, %182, %cst_41 {dimension_numbers = #tpu.dot_dimension_numbers<[1], [0], [0], [1], [0, 0, 1, 1], [], []>} : vector<8x32xf32>, vector<32x128xf32>, vector<8x128xf32> -> vector<8x128xf32>
    %c0_42 = arith.constant 0 : index
    %c0_43 = arith.constant 0 : index
    %184 = vector.load %arg5[%c0_42, %c0_43] : memref<1x128xf32, #tpu.memory_space<vmem>>, vector<1x128xf32>
    %185 = vector.broadcast %184 : vector<1x128xf32> to vector<8x128xf32>
    %186 = arith.addf %183, %185 : vector<8x128xf32>
    %c0_44 = arith.constant 0 : index
    %c0_45 = arith.constant 0 : index
    %187 = vector.load %arg6[%c0_44, %c0_45] : memref<8x128xf32, #tpu.memory_space<vmem>>, vector<8x128xf32>
    tpu.vector_store %arg6[%c0_44, %c0_45], %186 {strides = array<i32>} : memref<8x128xf32, #tpu.memory_space<vmem>>, vector<8x128xf32>,
    return
  }
  func.func @transform_0(%arg0: i32) -> (i32, i32) {
    %c0_i32 = arith.constant 0 : i32
    %c0_i32_0 = arith.constant 0 : i32
    return %arg0, %c0_i32 : i32, i32
  }
  func.func @transform_1(%arg0: i32) -> (i32, i32) {
    %c0_i32 = arith.constant 0 : i32
    %c0_i32_0 = arith.constant 0 : i32
    %c0_i32_1 = arith.constant 0 : i32
    return %c0_i32, %c0_i32_0 : i32, i32
  }
  func.func @transform_2(%arg0: i32) -> (i32, i32) {
    %c0_i32 = arith.constant 0 : i32
    %c0_i32_0 = arith.constant 0 : i32
    %c0_i32_1 = arith.constant 0 : i32
    return %c0_i32, %c0_i32_0 : i32, i32
  }
  func.func @transform_3(%arg0: i32) -> (i32, i32) {
    %c0_i32 = arith.constant 0 : i32
    %c0_i32_0 = arith.constant 0 : i32
    %c0_i32_1 = arith.constant 0 : i32
    return %c0_i32, %c0_i32_0 : i32, i32
  }
  func.func @transform_4(%arg0: i32) -> (i32, i32) {
    %c0_i32 = arith.constant 0 : i32
    %c0_i32_0 = arith.constant 0 : i32
    %c0_i32_1 = arith.constant 0 : i32
    return %c0_i32, %c0_i32_0 : i32, i32
  }
  func.func @transform_5(%arg0: i32) -> (i32, i32) {
    %c0_i32 = arith.constant 0 : i32
    %c0_i32_0 = arith.constant 0 : i32
    return %arg0, %c0_i32 : i32, i32
  }
}

</mosaic_0001>

<bundles_post_ra>
// kernel: _forward_impl.1
= control target key start
LH: loop header
LB: loop body
LE: loop exit
PB: predicated region body
PF: predicated region fallthrough
CT: control target
= control target key end

     0   :  { %10 = vsyncpa [#allocation3], 0  ;;  %s1808_s0 = inlined_call_operand.vmem [shape: s32[8,8], index: 0, kind: input, shape index: {}]   ;;  %s1809_s1 = inlined_call_operand.hbm [shape: f32[128,128], index: 1, kind: input, shape index: {}]   ;;  %s1810_s2 = inlined_call_operand.hbm [shape: f32[32,128], index: 2, kind: input, shape index: {}]   ;;  %s1811_s3 = inlined_call_operand.hbm [shape: f32[32,128], index: 3, kind: input, shape index: {}]   ;;  %s1812_s4 = inlined_call_operand.vmem [shape: f32[1,128], index: 4, kind: input, shape index: {}]   ;;  %s1813_s5 = inlined_call_operand.vmem [shape: f32[8,128], index: 5, kind: output, shape index: {}]  }
   0x1   :  { %11 = vsyncpa [#allocation5], 0  ;;  %s1577_s18 = smov [#allocation4]   ;;  %s1578_s20 = smov [#allocation2]  }
   0x2   :  { %s31_s19 = sshll.u32 %s1577_s18, 4  ;;  %s19_s21 = sshll.u32 %s1578_s20, 4  ;;  %s32_s19 = int_to_ptr.vmem [resolvable:$true] %s31_s19  ;;  %s20_s21 = int_to_ptr.vmem [resolvable:$true] %s19_s21 }
   0x3   :  { %s1521_s22 = scalar_lea.vmem %s32_s19, 512  ;;  %p1526_p1 = scmp.lt.s32.totalorder %s32_s19, %s32_s19 }
   0x4   :  { %p1522_p0 = scmp.ne.s32.totalorder %s32_s19, %s1521_s22  ;;  %p1527_p2 = scmp.lt.s32.totalorder %s1521_s22, %s1521_s22 }
   0x6   :  { %p1528_p3 = por %p1527_p2, %p1526_p1 }
   0x8   :  { %p1529_p4 = pnand %p1528_p3, %p1522_p0 }
   0xa   :  { %1532 = shalt.err (!%p1529_p4)
}
   0xb   :  { %s1579_s23 = smov 128   ;;  %s1580_s24 = smov 8  }
   0xc   :  { %37 = dma.hbm_to_vmem [thread:$0]  %s1810_s2, 512, %s32_s19, [#allocation5], %s1579_s23, %s1579_s23, %s1580_s24  }
   0xd   :  { %s1541_s27 = scalar_lea.vmem %s20_s21, 2048  ;;  %p1546_p6 = scmp.lt.s32.totalorder %s20_s21, %s20_s21 }
   0xe   :  { %p1542_p5 = scmp.ne.s32.totalorder %s20_s21, %s1541_s27  ;;  %p1547_p7 = scmp.lt.s32.totalorder %s1541_s27, %s1541_s27 }
  0x10   :  { %p1548_p8 = por %p1547_p7, %p1546_p6 }
  0x12   :  { %p1549_p9 = pnand %p1548_p8, %p1542_p5 }
  0x14   :  { %1552 = shalt.err (!%p1549_p9)
}
  0x15   :  { %25 = dma.hbm_to_vmem [thread:$0]  %s1809_s1, 2048, %s20_s21, [#allocation3], %s1579_s23, %s1579_s23, %s1580_s24  }
  0x16   :  { %s1581_s30 = smov [#allocation6]  }
  0x17   :  { %s43_s6 = sshll.u32 %s1581_s30, 4  ;;  %s44_s6 = int_to_ptr.vmem [resolvable:$true] %s43_s6 }
  0x18   :  { %s1561_s7 = scalar_lea.vmem %s44_s6, 512  ;;  %p1566_p11 = scmp.lt.s32.totalorder %s44_s6, %s44_s6 }
  0x19   :  { %p1562_p10 = scmp.ne.s32.totalorder %s44_s6, %s1561_s7  ;;  %p1567_p12 = scmp.lt.s32.totalorder %s1561_s7, %s1561_s7 }
  0x1b   :  { %p1568_p13 = por %p1567_p12, %p1566_p11 }
  0x1d   :  { %p1569_p0 = pnand %p1568_p13, %p1562_p10 }
  0x1f   :  { %1572 = shalt.err (!%p1569_p0)
}
  0x20   :  { %49 = dma.hbm_to_vmem [thread:$0]  %s1811_s3, 512, %s44_s6, [#allocation5], %s1579_s23, %s1579_s23, %s1580_s24  }
  0x21   :  { %1573 = dma.done.wait [#allocation3], 2048  }
  0x22   :  { %1574 = vsyncadd [#allocation3], 4294965248 }
  0x23   :  { %1575 = dma.done.wait [#allocation5], 1024  }
  0x24   :  { %1576 = vsyncadd [#allocation5], 4294966272  ;;  %v61_v0 = vld [vmem:[%s1808_s0] sm:$0xff]  ;;  %v191_v1 = vld [vmem:[#allocation2 + $0x78] sm:$0xff]  ;;  %v1582_v4 = vmov 0.0   ;;  %v94_v20 = vlaneseq  ;;  %vm1583_vm0 = vmmov 0  }
  0x25   :  { %v190_v2 = vld [vmem:[#allocation2 + $0x70] sm:$0xff]  ;;  %62 = vxpose.xlu0.b32.start.end [1/1] (short) (narrow) %v61_v0, 8  ;;  %1311 = vmatprep.subr.mxu0 %v191_v1  ;;  %v189_v3 = vld [vmem:[#allocation2 + $0x68] sm:$0xff]  ;;  %v188_v5 = vld [vmem:[#allocation2 + $0x60] sm:$0xff]  ;;  %v1584_v32 = vmov 1.0   ;;  %s1585_s0 = smov 64  }
  0x26   :  { %1312 = vmatpush3.msra.mxu0 %v191_v1  ;;  %1355 = vmatprep.subr.mxu1 %v1582_v4  ;;  %v1630_v6 = vld [vmem:[#allocation4 + $0x18] sm:$0xff]  ;;  %v1633_v7 = vld [vmem:[#allocation4 + $0x10] sm:$0xff]  ;;  %v1636_v9 = vld [vmem:[#allocation4 + $0x8] sm:$0xff]  ;;  %v1648_v23 = vshrl.u32 %v94_v20, 7  ;;  %v1668_v29 = vand.u32 127, %v94_v20  ;;  %s1586_s3 = smov 32  }
  0x27   :  { %1313 = vmatprep.subr.mxu0 %v190_v2  ;;  %1356 = vmatpush3.msra.mxu1 %v1630_v6  ;;  %v187_v8 = vld [vmem:[#allocation2 + $0x58] sm:$0xff]  ;;  %v186_v10 = vld [vmem:[#allocation2 + $0x50] sm:$0xff]  ;;  %v185_v11 = vld [vmem:[#allocation2 + $0x48] sm:$0xff]  ;;  %vm301_vm3 = vcmask 261120  }
  0x28   :  { %1314 = vmatpush3.msra.mxu0 %v190_v2  ;;  %1357 = vmatprep.subr.mxu1 %v1582_v4  ;;  %v184_v12 = vld [vmem:[#allocation2 + $0x40] sm:$0xff]  ;;  %v183_v13 = vld [vmem:[#allocation2 + $0x38] sm:$0xff]  ;;  %v182_v14 = vld [vmem:[#allocation2 + $0x30] sm:$0xff]  ;;  %v105_v24 = vsub.s32 1, %v1648_v23  ;;  %v98_v25 = vsub.s32 0, %v1648_v23 }
  0x29   :  { %1315 = vmatprep.subr.mxu0 %v189_v3  ;;  %1358 = vmatpush3.msra.mxu1 %v1633_v7  ;;  %v181_v15 = vld [vmem:[#allocation2 + $0x28] sm:$0xff]  ;;  %v180_v16 = vld [vmem:[#allocation2 + $0x20] sm:$0xff]  ;;  %v179_v17 = vld [vmem:[#allocation2 + $0x18] sm:$0xff] }
  0x2a   :  { %1316 = vmatpush3.msra.mxu0 %v189_v3  ;;  %1359 = vmatprep.subr.mxu1 %v1582_v4  ;;  %v178_v18 = vld [vmem:[#allocation2 + $0x10] sm:$0xff]  ;;  %v177_v19 = vld [vmem:[#allocation2 + $0x8] sm:$0xff]  ;;  %v176_v21 = vld [vmem:[#allocation2] sm:$0xff]  ;;  %v112_v3 = vsub.s32 2, %v1648_v23 }
  0x2b   :  { %1317 = vmatprep.subr.mxu0 %v188_v5  ;;  %1360 = vmatpush3.msra.mxu1 %v1636_v9  ;;  %v1642_v22 = vld [vmem:[#allocation4] sm:$0xff] }
  0x2c   :  { %1318 = vmatpush3.msra.mxu0 %v188_v5  ;;  %1361 = vmatprep.subr.mxu1 %v1582_v4 }
  0x2d   :  { %1319 = vmatprep.subr.mxu0 %v187_v8  ;;  %1362 = vmatpush3.msra.mxu1 %v1642_v22 }
  0x2e   :  { %1320 = vmatpush3.msra.mxu0 %v187_v8  ;;  %1363 = vmatprep.mubr.msk.f32.mxu1 %vm1583_vm0, %v1582_v4 }
  0x2f   :  { %1321 = vmatprep.subr.mxu0 %v186_v10  ;;  %1366 = vmatprep.subr.mxu1 %v1582_v4 }
  0x30   :  { %1322 = vmatpush3.msra.mxu0 %v186_v10  ;;  %1364 = vmatmul.mubr.f32.vlgmr.msra.gmra.mxu1 %v1582_v4  ;;  %v119_v10 = vsub.s32 3, %v1648_v23 }
  0x31   :  { %1323 = vmatprep.subr.mxu0 %v185_v11  ;;  %1367 = vmatpush3.msra.mxu1 %v1630_v6 }
  0x32   :  { %1324 = vmatpush3.msra.mxu0 %v185_v11  ;;  %1374 = vmatprep.mubr.msk.f32.mxu1 %vm1583_vm0, %v1582_v4 }
  0x33   :  { %1325 = vmatprep.subr.mxu0 %v184_v12  ;;  %1368 = vmatprep.subr.mxu1 %v1582_v4 }
  0x34   :  { %1326 = vmatpush3.msra.mxu0 %v184_v12  ;;  %1369 = vmatpush3.msra.mxu1 %v1633_v7 }
  0x35   :  { %1327 = vmatprep.subr.mxu0 %v183_v13  ;;  %1370 = vmatprep.subr.mxu1 %v1582_v4 }
  0x36   :  { %1328 = vmatpush3.msra.mxu0 %v183_v13  ;;  %1371 = vmatpush3.msra.mxu1 %v1636_v9 }
  0x37   :  { %1329 = vmatprep.subr.mxu0 %v182_v14  ;;  %1372 = vmatprep.subr.mxu1 %v1582_v4 }
  0x38   :  { %1330 = vmatpush3.msra.mxu0 %v182_v14  ;;  %1373 = vmatpush3.msra.mxu1 %v1642_v22 }
  0x39   :  { %1331 = vmatprep.subr.mxu0 %v181_v15  ;;  %1377 = vmatprep.subr.mxu1 %v1582_v4 }
  0x3a   :  { %1332 = vmatpush3.msra.mxu0 %v181_v15 }
  0x3b   :  { %1333 = vmatprep.subr.mxu0 %v180_v16 }
  0x3c   :  { %1334 = vmatpush3.msra.mxu0 %v180_v16 }
  0x3d   :  { %1335 = vmatprep.subr.mxu0 %v179_v17 }
  0x3e   :  { %1336 = vmatpush3.msra.mxu0 %v179_v17 }
  0x3f   :  { %1337 = vmatprep.subr.mxu0 %v178_v18 }
  0x40   :  { %1338 = vmatpush3.msra.mxu0 %v178_v18 }
  0x41   :  { %1339 = vmatprep.subr.mxu0 %v177_v19 }
  0x42   :  { %1340 = vmatpush3.msra.mxu0 %v177_v19 }
  0x43   :  { %1341 = vmatprep.subr.mxu0 %v176_v21 }
  0x44   :  { %1342 = vmatpush3.msra.mxu0 %v176_v21 }
  0x45   :  { %1410 = vmatprep.subr.mxu0 %v1582_v4 }
  0xa1   :  { %v1662_v26 = vpop.trf.xlu0 }
  0xa2   :  { %v106_v27 = vrot.slane %v1662_v26, %v105_v24  ;;  %v99_v28 = vrot.slane %v1662_v26, %v98_v25  ;;  %v113_v8 = vrot.slane %v1662_v26, %v112_v3  ;;  %v120_v11 = vrot.slane %v1662_v26, %v119_v10 }
  0xa4   :  { %108 = vbcast.lane.b32.xlu1 %v106_v27, 256  ;;  %101 = vbcast.lane.b32.xlu0 %v99_v28, 256 }
  0xf0   :  { %v371_v33 = vpop.f32.mrf.mxu1 }
  0xf2   :  { %v1365_v34 = vpop.f32.mrf.mxu1 }
 0x116   :  { %v109_v30 = vpop.permute.xlu1 %108  ;;  %v102_v31 = vpop.permute.xlu0 %101 }
 0x117   :  { %vm153_vm1 = vcmp.eq.s32.totalorder %v1668_v29, %v109_v30  ;;  %vm152_vm2 = vcmp.eq.s32.totalorder %v1668_v29, %v102_v31 }
 0x118   :  { %1343 = vmatprep.mubr.msk.f32.mxu0 %vm152_vm2, %v1584_v32 }
 0x119   :  { %1344 = vmatmul.mubr.msk.f32.vlgmr.msra.gmra.mxu0 %vm153_vm1, %v1584_v32 }
 0x11a   :  { %1411 = vmatpush3.msra.mxu0 %v1630_v6 }
 0x11b   :  { %1412 = vmatprep.subr.mxu0 %v1582_v4 }
 0x11c   :  { %1413 = vmatpush3.msra.mxu0 %v1633_v7 }
 0x11d   :  { %1414 = vmatprep.subr.mxu0 %v1582_v4 }
 0x11e   :  { %1415 = vmatpush3.msra.mxu0 %v1636_v9 }
 0x11f   :  { %1416 = vmatprep.subr.mxu0 %v1582_v4 }
 0x120   :  { %1417 = vmatpush3.msra.mxu0 %v1642_v22 }
 0x121   :  { %1432 = vmatprep.subr.mxu0 %v1582_v4 }
 0x1d9   :  { %v1345_v35 = vpop.f32.mrf.mxu0 }
 0x1db   :  { %v258_v36 = vpop.f32.mrf.mxu0 }
 0x1dc   :  { %v375_v37 = vadd.f32 %v371_v33, %v258_v36 }
 0x1de   :  { %v1217_v38 = vmul.f32 -1.442695, %v375_v37 }
 0x1e0   :  { %1465 = vpow2.f32 %v1217_v38 }
 0x1ed   :  { %v1466_v39 = vpop.eup %1465 }
 0x1ee   :  { %v379_v40 = vadd.f32 1.0, %v1466_v39 }
 0x1f0   :  { %1467 = vrcp.f32 %v379_v40 }
 0x1fd   :  { %v1468_v41 = vpop.eup %1467 }
 0x1fe   :  { %v382_v42 = vmul.f32 2.0, %v1468_v41  ;;  %v384_v46 = vmul.f32 0.0, %v1468_v41 }
 0x200   :  { %v1218_v43 = vadd.f32 -1.0, %v382_v42 }
 0x202   :  { %386 = vrot.lane.b32.xlu1 %v1218_v43, %s1585_s0 }
 0x274   :  { %v387_v44 = vpop.permute.xlu1 %386 }
 0x275   :  { %v389_v45 = vmul.f32 %v1468_v41, %v387_v44 }
 0x277   :  { %391 = vrot.lane.b32.xlu1 %v389_v45, %s1586_s3 }
 0x2e9   :  { %v392_v47 = vpop.permute.xlu1 %391 }
 0x2ea   :  { %v394_v48 = vadd.f32 %v392_v47, %v384_v46 }
 0x2ec   :  { %1469 = vtanh.f32 %v394_v48 }
 0x2f9   :  { %v1470_v49 = vpop.eup %1469 }
 0x2fa   :  { %397 = vrot.lane.b32.xlu1 %v1470_v49, %s1585_s0 }
 0x36c   :  { %v398_v50 = vpop.permute.xlu1 %397 }
 0x36d   :  { %v400_v51 = vmul.f32 %v1468_v41, %v398_v50 }
 0x36f   :  { %402 = vrot.lane.b32.xlu1 %v400_v51, %s1586_s3 }
 0x3e1   :  { %v403_v52 = vpop.permute.xlu1 %402 }
 0x3e2   :  { %1375 = vmatmul.mubr.msk.f32.vlgmr.msra.gmra.mxu1 %vm301_vm3, %v403_v52 }
 0x3e3   :  { %1378 = vmatpush3.msra.mxu1 %v1630_v6  ;;  %1385 = vmatprep.mubr.msk.f32.mxu1 %vm1583_vm0, %v1582_v4 }
 0x3e4   :  { %1379 = vmatprep.subr.mxu1 %v1582_v4 }
 0x3e5   :  { %1380 = vmatpush3.msra.mxu1 %v1633_v7 }
 0x3e6   :  { %1381 = vmatprep.subr.mxu1 %v1582_v4 }
 0x3e7   :  { %1382 = vmatpush3.msra.mxu1 %v1636_v9 }
 0x3e8   :  { %1383 = vmatprep.subr.mxu1 %v1582_v4 }
 0x3e9   :  { %1384 = vmatpush3.msra.mxu1 %v1642_v22 }
 0x3ea   :  { %1388 = vmatprep.subr.mxu1 %v1582_v4 }
 0x4a2   :  { %v472_v53 = vpop.f32.mrf.mxu1 }
 0x4a3   :  { %v476_v54 = vadd.f32 %v1345_v35, %v472_v53  ;;  %v126_v53 = vsub.s32 4, %v1648_v23 }
 0x4a4   :  { %v1376_v55 = vpop.f32.mrf.mxu1 }
 0x4a5   :  { %v1220_v56 = vmul.f32 -1.442695, %v476_v54  ;;  %v127_v54 = vrot.slane %v1662_v26, %v126_v53 }
 0x4a7   :  { %1471 = vpow2.f32 %v1220_v56 }
 0x4b4   :  { %v1472_v57 = vpop.eup %1471 }
 0x4b5   :  { %v480_v58 = vadd.f32 1.0, %v1472_v57 }
 0x4b7   :  { %1473 = vrcp.f32 %v480_v58 }
 0x4c4   :  { %v1474_v59 = vpop.eup %1473 }
 0x4c5   :  { %v483_v60 = vmul.f32 2.0, %v1474_v59  ;;  %v485_v0 = vmul.f32 %v1474_v59, %v394_v48 }
 0x4c7   :  { %v1221_v61 = vadd.f32 -1.0, %v483_v60 }
 0x4c9   :  { %487 = vrot.lane.b32.xlu1 %v1221_v61, %s1585_s0 }
 0x53b   :  { %v488_v62 = vpop.permute.xlu1 %487 }
 0x53c   :  { %v490_v63 = vmul.f32 %v1474_v59, %v488_v62 }
 0x53e   :  { %492 = vrot.lane.b32.xlu1 %v490_v63, %s1586_s3 }
 0x5b0   :  { %v493_v1 = vpop.permute.xlu1 %492 }
 0x5b1   :  { %v495_v2 = vadd.f32 %v493_v1, %v485_v0 }
 0x5b3   :  { %1475 = vtanh.f32 %v495_v2 }
 0x5c0   :  { %v1476_v5 = vpop.eup %1475 }
 0x5c1   :  { %498 = vrot.lane.b32.xlu1 %v1476_v5, %s1585_s0 }
 0x5c5   :  { %115 = vbcast.lane.b32.xlu1 %v113_v8, 256 }
 0x5c9   :  { %122 = vbcast.lane.b32.xlu1 %v120_v11, 256 }
 0x633   :  { %v499_v12 = vpop.permute.xlu1 %498 }
 0x634   :  { %v501_v13 = vmul.f32 %v1474_v59, %v499_v12  ;;  %v133_v59 = vsub.s32 5, %v1648_v23 }
 0x636   :  { %503 = vrot.lane.b32.xlu1 %v501_v13, %s1586_s3  ;;  %v134_v61 = vrot.slane %v1662_v26, %v133_v59 }
 0x637   :  { %v116_v14 = vpop.permute.xlu1 %115 }
 0x638   :  { %vm154_vm4 = vcmp.eq.s32.totalorder %v1668_v29, %v116_v14 }
 0x639   :  { %1346 = vmatprep.mubr.msk.f32.mxu0 %vm154_vm4, %v1584_v32 }
 0x63b   :  { %v123_v15 = vpop.permute.xlu1 %122 }
 0x63c   :  { %vm155_vm5 = vcmp.eq.s32.totalorder %v1668_v29, %v123_v15 }
 0x63d   :  { %1347 = vmatmul.mubr.msk.f32.gmra.mxu0 %vm155_vm5, %v1584_v32 }
 0x6a8   :  { %v504_v16 = vpop.permute.xlu1 %503 }
 0x6a9   :  { %1386 = vmatmul.mubr.msk.f32.vlgmr.msra.gmra.mxu1 %vm301_vm3, %v504_v16 }
 0x6aa   :  { %1389 = vmatpush3.msra.mxu1 %v1630_v6  ;;  %1396 = vmatprep.mubr.msk.f32.mxu1 %vm1583_vm0, %v1582_v4 }
 0x6ab   :  { %1390 = vmatprep.subr.mxu1 %v1582_v4 }
 0x6ac   :  { %1391 = vmatpush3.msra.mxu1 %v1633_v7 }
 0x6ad   :  { %1392 = vmatprep.subr.mxu1 %v1582_v4 }
 0x6ae   :  { %1393 = vmatpush3.msra.mxu1 %v1636_v9 }
 0x6af   :  { %1394 = vmatprep.subr.mxu1 %v1582_v4 }
 0x6b0   :  { %1395 = vmatpush3.msra.mxu1 %v1642_v22 }
 0x6b1   :  { %1399 = vmatprep.subr.mxu1 %v1582_v4 }
 0x6fd   :  { %v1348_v17 = vpop.f32.mrf.mxu0 }
 0x6ff   :  { %v268_v18 = vpop.f32.mrf.mxu0 }
 0x769   :  { %v573_v19 = vpop.f32.mrf.mxu1 }
 0x76a   :  { %v577_v20 = vadd.f32 %v573_v19, %v268_v18  ;;  %v140_v19 = vsub.s32 6, %v1648_v23 }
 0x76b   :  { %v1387_v21 = vpop.f32.mrf.mxu1 }
 0x76c   :  { %v1223_v24 = vmul.f32 -1.442695, %v577_v20  ;;  %v141_v20 = vrot.slane %v1662_v26, %v140_v19 }
 0x76e   :  { %1477 = vpow2.f32 %v1223_v24 }
 0x77b   :  { %v1478_v25 = vpop.eup %1477 }
 0x77c   :  { %v581_v27 = vadd.f32 1.0, %v1478_v25 }
 0x77e   :  { %1479 = vrcp.f32 %v581_v27 }
 0x78b   :  { %v1480_v28 = vpop.eup %1479 }
 0x78c   :  { %v584_v30 = vmul.f32 2.0, %v1480_v28  ;;  %v586_v35 = vmul.f32 %v1480_v28, %v495_v2 }
 0x78e   :  { %v1224_v31 = vadd.f32 -1.0, %v584_v30 }
 0x790   :  { %588 = vrot.lane.b32.xlu1 %v1224_v31, %s1585_s0 }
 0x802   :  { %v589_v33 = vpop.permute.xlu1 %588 }
 0x803   :  { %v591_v34 = vmul.f32 %v1480_v28, %v589_v33 }
 0x805   :  { %593 = vrot.lane.b32.xlu0 %v591_v34, %s1586_s3 }
 0x877   :  { %v594_v36 = vpop.permute.xlu0 %593 }
 0x878   :  { %v596_v37 = vadd.f32 %v594_v36, %v586_v35 }
 0x87a   :  { %1481 = vtanh.f32 %v596_v37 }
 0x887   :  { %v1482_v38 = vpop.eup %1481 }
 0x888   :  { %599 = vrot.lane.b32.xlu1 %v1482_v38, %s1585_s0 }
 0x8fa   :  { %v600_v39 = vpop.permute.xlu1 %599 }
 0x8fb   :  { %v602_v40 = vmul.f32 %v1480_v28, %v600_v39  ;;  %v147_v28 = vsub.s32 7, %v1648_v23 }
 0x8fd   :  { %604 = vrot.lane.b32.xlu0 %v602_v40, %s1586_s3  ;;  %v148_v31 = vrot.slane %v1662_v26, %v147_v28 }
 0x96f   :  { %v605_v41 = vpop.permute.xlu0 %604 }
 0x970   :  { %1397 = vmatmul.mubr.msk.f32.vlgmr.msra.gmra.mxu1 %vm301_vm3, %v605_v41 }
 0x971   :  { %1400 = vmatpush3.msra.mxu1 %v1630_v6  ;;  %1407 = vmatprep.mubr.msk.f32.mxu1 %vm1583_vm0, %v1582_v4 }
 0x972   :  { %1401 = vmatprep.subr.mxu1 %v1582_v4 }
 0x973   :  { %1402 = vmatpush3.msra.mxu1 %v1633_v7 }
 0x974   :  { %1403 = vmatprep.subr.mxu1 %v1582_v4 }
 0x975   :  { %1404 = vmatpush3.msra.mxu1 %v1636_v9 }
 0x976   :  { %1405 = vmatprep.subr.mxu1 %v1582_v4 }
 0x977   :  { %1406 = vmatpush3.msra.mxu1 %v1642_v22 }
 0x978   :  { %1421 = vmatprep.subr.mxu1 %v1582_v4 }
 0xa30   :  { %v674_v42 = vpop.f32.mrf.mxu1 }
 0xa31   :  { %v678_v43 = vadd.f32 %v1348_v17, %v674_v42 }
 0xa32   :  { %v1398_v44 = vpop.f32.mrf.mxu1 }
 0xa33   :  { %v1226_v45 = vmul.f32 -1.442695, %v678_v43 }
 0xa35   :  { %1483 = vpow2.f32 %v1226_v45 }
 0xa42   :  { %v1484_v46 = vpop.eup %1483 }
 0xa43   :  { %v682_v47 = vadd.f32 1.0, %v1484_v46 }
 0xa45   :  { %1485 = vrcp.f32 %v682_v47 }
 0xa52   :  { %v1486_v48 = vpop.eup %1485 }
 0xa53   :  { %v685_v49 = vmul.f32 2.0, %v1486_v48  ;;  %v687_v55 = vmul.f32 %v1486_v48, %v596_v37 }
 0xa55   :  { %v1227_v50 = vadd.f32 -1.0, %v685_v49 }
 0xa57   :  { %689 = vrot.lane.b32.xlu1 %v1227_v50, %s1585_s0 }
 0xac9   :  { %v690_v51 = vpop.permute.xlu1 %689 }
 0xaca   :  { %v692_v52 = vmul.f32 %v1486_v48, %v690_v51 }
 0xacc   :  { %694 = vrot.lane.b32.xlu0 %v692_v52, %s1586_s3 }
 0xad0   :  { %129 = vbcast.lane.b32.xlu0 %v127_v54, 256 }
 0xb3e   :  { %v695_v56 = vpop.permute.xlu0 %694 }
 0xb3f   :  { %v697_v57 = vadd.f32 %v695_v56, %v687_v55 }
 0xb41   :  { %1487 = vtanh.f32 %v697_v57 }
 0xb42   :  { %v130_v58 = vpop.permute.xlu0 %129 }
 0xb43   :  { %vm156_vm6 = vcmp.eq.s32.totalorder %v1668_v29, %v130_v58 }
 0xb44   :  { %1349 = vmatprep.mubr.msk.f32.mxu0 %vm156_vm6, %v1584_v32 }
 0xb4e   :  { %v1488_v60 = vpop.eup %1487 }
 0xb4f   :  { %700 = vrot.lane.b32.xlu1 %v1488_v60, %s1585_s0 }
 0xb53   :  { %136 = vbcast.lane.b32.xlu1 %v134_v61, 256 }
 0xbc1   :  { %v701_v62 = vpop.permute.xlu1 %700 }
 0xbc2   :  { %v703_v63 = vmul.f32 %v1486_v48, %v701_v62 }
 0xbc4   :  { %705 = vrot.lane.b32.xlu0 %v703_v63, %s1586_s3 }
 0xbc5   :  { %v137_v0 = vpop.permute.xlu1 %136 }
 0xbc6   :  { %vm157_vm7 = vcmp.eq.s32.totalorder %v1668_v29, %v137_v0 }
 0xbc7   :  { %1350 = vmatmul.mubr.msk.f32.gmra.mxu0 %vm157_vm7, %v1584_v32 }
 0xc36   :  { %v706_v1 = vpop.permute.xlu0 %705 }
 0xc37   :  { %1408 = vmatmul.mubr.msk.f32.vlgmr.msra.gmra.mxu1 %vm301_vm3, %v706_v1 }
 0xc38   :  { %1422 = vmatpush3.msra.mxu1 %v1630_v6  ;;  %1429 = vmatprep.mubr.msk.f32.mxu1 %vm1583_vm0, %v1582_v4 }
 0xc39   :  { %1423 = vmatprep.subr.mxu1 %v1582_v4 }
 0xc3a   :  { %1424 = vmatpush3.msra.mxu1 %v1633_v7 }
 0xc3b   :  { %1425 = vmatprep.subr.mxu1 %v1582_v4 }
 0xc3c   :  { %1426 = vmatpush3.msra.mxu1 %v1636_v9 }
 0xc3d   :  { %1427 = vmatprep.subr.mxu1 %v1582_v4 }
 0xc3e   :  { %1428 = vmatpush3.msra.mxu1 %v1642_v22 }
 0xc3f   :  { %1443 = vmatprep.subr.mxu1 %v1582_v4 }
 0xc87   :  { %v1351_v2 = vpop.f32.mrf.mxu0 }
 0xc89   :  { %v278_v3 = vpop.f32.mrf.mxu0 }
 0xcf7   :  { %v775_v5 = vpop.f32.mrf.mxu1 }
 0xcf8   :  { %v779_v8 = vadd.f32 %v775_v5, %v278_v3 }
 0xcf9   :  { %v1409_v10 = vpop.f32.mrf.mxu1 }
 0xcfa   :  { %v1229_v11 = vmul.f32 -1.442695, %v779_v8 }
 0xcfc   :  { %1489 = vpow2.f32 %v1229_v11 }
 0xd09   :  { %v1490_v12 = vpop.eup %1489 }
 0xd0a   :  { %v783_v13 = vadd.f32 1.0, %v1490_v12 }
 0xd0c   :  { %1491 = vrcp.f32 %v783_v13 }
 0xd19   :  { %v1492_v14 = vpop.eup %1491 }
 0xd1a   :  { %v786_v15 = vmul.f32 2.0, %v1492_v14  ;;  %v788_v21 = vmul.f32 %v1492_v14, %v697_v57 }
 0xd1c   :  { %v1230_v16 = vadd.f32 -1.0, %v786_v15 }
 0xd1e   :  { %790 = vrot.lane.b32.xlu1 %v1230_v16, %s1585_s0 }
 0xd90   :  { %v791_v17 = vpop.permute.xlu1 %790 }
 0xd91   :  { %v793_v18 = vmul.f32 %v1492_v14, %v791_v17 }
 0xd93   :  { %795 = vrot.lane.b32.xlu0 %v793_v18, %s1586_s3 }
 0xd97   :  { %143 = vbcast.lane.b32.xlu0 %v141_v20, 256 }
 0xe05   :  { %v796_v24 = vpop.permute.xlu0 %795 }
 0xe06   :  { %v798_v25 = vadd.f32 %v796_v24, %v788_v21  ;;  %v1111_v21 = vld [vmem:[#allocation6 + $0x18] sm:$0xff]  ;;  %v1110_v24 = vld [vmem:[#allocation6 + $0x10] sm:$0xff] }
 0xe08   :  { %1493 = vtanh.f32 %v798_v25 }
 0xe09   :  { %v144_v27 = vpop.permute.xlu0 %143 }
 0xe0a   :  { %vm158_vm8 = vcmp.eq.s32.totalorder %v1668_v29, %v144_v27  ;;  %v1108_v27 = vld [vmem:[#allocation6] sm:$0xff] }
 0xe0b   :  { %1352 = vmatprep.mubr.msk.f32.mxu0 %vm158_vm8, %v1584_v32 }
 0xe15   :  { %v1494_v30 = vpop.eup %1493 }
 0xe16   :  { %801 = vrot.lane.b32.xlu1 %v1494_v30, %s1585_s0 }
 0xe1a   :  { %150 = vbcast.lane.b32.xlu1 %v148_v31, 256 }
 0xe88   :  { %v802_v33 = vpop.permute.xlu1 %801 }
 0xe89   :  { %v804_v34 = vmul.f32 %v1492_v14, %v802_v33 }
 0xe8b   :  { %806 = vrot.lane.b32.xlu0 %v804_v34, %s1586_s3  ;;  %v1240_v34 = vld [vmem:[%s1812_s4] ss:$0 sm:$0xff] }
 0xe8c   :  { %v151_v35 = vpop.permute.xlu1 %150 }
 0xe8d   :  { %vm159_vm9 = vcmp.eq.s32.totalorder %v1668_v29, %v151_v35 }
 0xe8e   :  { %1353 = vmatmul.mubr.msk.f32.gmra.mxu0 %vm159_vm9, %v1584_v32 }
 0xe8f   :  { %1418 = vmatprep.mubr.msk.f32.mxu0 %vm1583_vm0, %v1582_v4 }
 0xefd   :  { %v807_v36 = vpop.permute.xlu0 %806 }
 0xefe   :  { %1419 = vmatmul.mubr.msk.f32.vlgmr.msra.gmra.mxu0 %vm301_vm3, %v807_v36 }
 0xeff   :  { %1433 = vmatpush3.msra.mxu0 %v1630_v6  ;;  %1440 = vmatprep.mubr.msk.f32.mxu0 %vm1583_vm0, %v1582_v4 }
 0xf00   :  { %1434 = vmatprep.subr.mxu0 %v1582_v4 }
 0xf01   :  { %1435 = vmatpush3.msra.mxu0 %v1633_v7 }
 0xf02   :  { %1436 = vmatprep.subr.mxu0 %v1582_v4 }
 0xf03   :  { %1437 = vmatpush3.msra.mxu0 %v1636_v9 }
 0xf04   :  { %1438 = vmatprep.subr.mxu0 %v1582_v4 }
 0xf05   :  { %1439 = vmatpush3.msra.mxu0 %v1642_v22 }
 0xf4e   :  { %v1354_v23 = vpop.f32.mrf.mxu0 }
 0xf50   :  { %v288_v26 = vpop.f32.mrf.mxu0 }
 0xfbe   :  { %v876_v29 = vpop.f32.mrf.mxu0 }
 0xfbf   :  { %v880_v32 = vadd.f32 %v1351_v2, %v876_v29 }
 0xfc0   :  { %v1420_v6 = vpop.f32.mrf.mxu0 }
 0xfc1   :  { %v1232_v37 = vmul.f32 -1.442695, %v880_v32 }
 0xfc3   :  { %1495 = vpow2.f32 %v1232_v37 }
 0xfd0   :  { %v1496_v38 = vpop.eup %1495 }
 0xfd1   :  { %v884_v39 = vadd.f32 1.0, %v1496_v38 }
 0xfd3   :  { %1497 = vrcp.f32 %v884_v39 }
 0xfe0   :  { %v1498_v40 = vpop.eup %1497 }
 0xfe1   :  { %v887_v7 = vmul.f32 2.0, %v1498_v40  ;;  %v889_v22 = vmul.f32 %v1498_v40, %v798_v25  ;;  %v1109_v25 = vld [vmem:[#allocation6 + $0x8] sm:$0xff] }
 0xfe3   :  { %v1233_v41 = vadd.f32 -1.0, %v887_v7 }
 0xfe5   :  { %891 = vrot.lane.b32.xlu1 %v1233_v41, %s1585_s0 }
0x1057   :  { %v892_v9 = vpop.permute.xlu1 %891 }
0x1058   :  { %v894_v42 = vmul.f32 %v1498_v40, %v892_v9 }
0x105a   :  { %896 = vrot.lane.b32.xlu0 %v894_v42, %s1586_s3 }
0x10cc   :  { %v897_v43 = vpop.permute.xlu0 %896 }
0x10cd   :  { %v899_v44 = vadd.f32 %v897_v43, %v889_v22 }
0x10cf   :  { %1499 = vtanh.f32 %v899_v44 }
0x10dc   :  { %v1500_v45 = vpop.eup %1499 }
0x10dd   :  { %902 = vrot.lane.b32.xlu1 %v1500_v45, %s1585_s0 }
0x114f   :  { %v903_v46 = vpop.permute.xlu1 %902 }
0x1150   :  { %v905_v47 = vmul.f32 %v1498_v40, %v903_v46 }
0x1152   :  { %907 = vrot.lane.b32.xlu0 %v905_v47, %s1586_s3 }
0x11c4   :  { %v908_v48 = vpop.permute.xlu0 %907 }
0x11c5   :  { %1430 = vmatmul.mubr.msk.f32.vlgmr.msra.gmra.mxu1 %vm301_vm3, %v908_v48 }
0x11c6   :  { %1451 = vmatprep.mubr.msk.f32.mxu1 %vm1583_vm0, %v1582_v4  ;;  %1444 = vmatpush3.msra.mxu1 %v1111_v21 }
0x11c7   :  { %1445 = vmatprep.subr.mxu1 %v1582_v4 }
0x11c8   :  { %1446 = vmatpush3.msra.mxu1 %v1110_v24 }
0x11c9   :  { %1447 = vmatprep.subr.mxu1 %v1582_v4 }
0x11ca   :  { %1448 = vmatpush3.msra.mxu1 %v1109_v25 }
0x11cb   :  { %1449 = vmatprep.subr.mxu1 %v1582_v4 }
0x11cc   :  { %1450 = vmatpush3.msra.mxu1 %v1108_v27 }
0x1285   :  { %v977_v49 = vpop.f32.mrf.mxu1 }
0x1286   :  { %v981_v50 = vadd.f32 %v977_v49, %v288_v26 }
0x1287   :  { %v1431_v51 = vpop.f32.mrf.mxu1 }
0x1288   :  { %v1235_v52 = vmul.f32 -1.442695, %v981_v50 }
0x128a   :  { %1501 = vpow2.f32 %v1235_v52 }
0x1297   :  { %v1502_v53 = vpop.eup %1501 }
0x1298   :  { %v985_v54 = vadd.f32 1.0, %v1502_v53 }
0x129a   :  { %1503 = vrcp.f32 %v985_v54 }
0x12a7   :  { %v1504_v55 = vpop.eup %1503 }
0x12a8   :  { %v988_v56 = vmul.f32 2.0, %v1504_v55  ;;  %v990_v60 = vmul.f32 %v1504_v55, %v899_v44 }
0x12aa   :  { %v1236_v57 = vadd.f32 -1.0, %v988_v56 }
0x12ac   :  { %992 = vrot.lane.b32.xlu1 %v1236_v57, %s1585_s0 }
0x131e   :  { %v993_v58 = vpop.permute.xlu1 %992 }
0x131f   :  { %v995_v59 = vmul.f32 %v1504_v55, %v993_v58 }
0x1321   :  { %997 = vrot.lane.b32.xlu0 %v995_v59, %s1586_s3 }
0x1393   :  { %v998_v61 = vpop.permute.xlu0 %997 }
0x1394   :  { %v1000_v62 = vadd.f32 %v998_v61, %v990_v60 }
0x1396   :  { %1505 = vtanh.f32 %v1000_v62 }
0x13a3   :  { %v1506_v63 = vpop.eup %1505 }
0x13a4   :  { %1003 = vrot.lane.b32.xlu1 %v1506_v63, %s1585_s0 }
0x1416   :  { %v1004_v0 = vpop.permute.xlu1 %1003 }
0x1417   :  { %v1006_v1 = vmul.f32 %v1504_v55, %v1004_v0 }
0x1419   :  { %1008 = vrot.lane.b32.xlu0 %v1006_v1, %s1586_s3 }
0x148b   :  { %v1009_v2 = vpop.permute.xlu0 %1008 }
0x148c   :  { %1441 = vmatmul.mubr.msk.f32.vlgmr.msra.gmra.mxu0 %vm301_vm3, %v1009_v2 }
0x154c   :  { %v1078_v3 = vpop.f32.mrf.mxu0 }
0x154d   :  { %v1082_v5 = vadd.f32 %v1354_v23, %v1078_v3 }
0x154e   :  { %v1442_v8 = vpop.f32.mrf.mxu0 }
0x154f   :  { %v1238_v10 = vmul.f32 -1.442695, %v1082_v5 }
0x1551   :  { %1507 = vpow2.f32 %v1238_v10 }
0x155e   :  { %v1508_v11 = vpop.eup %1507 }
0x155f   :  { %v1086_v12 = vadd.f32 1.0, %v1508_v11 }
0x1561   :  { %1509 = vrcp.f32 %v1086_v12 }
0x156e   :  { %v1510_v13 = vpop.eup %1509 }
0x156f   :  { %v1089_v14 = vmul.f32 2.0, %v1510_v13  ;;  %v1091_v18 = vmul.f32 %v1510_v13, %v1000_v62 }
0x1571   :  { %v1239_v15 = vadd.f32 -1.0, %v1089_v14 }
0x1573   :  { %1093 = vrot.lane.b32.xlu1 %v1239_v15, %s1585_s0 }
0x15e5   :  { %v1094_v16 = vpop.permute.xlu1 %1093 }
0x15e6   :  { %v1096_v17 = vmul.f32 %v1510_v13, %v1094_v16 }
0x15e8   :  { %1098 = vrot.lane.b32.xlu0 %v1096_v17, %s1586_s3 }
0x165a   :  { %v1099_v19 = vpop.permute.xlu0 %1098 }
0x165b   :  { %v1101_v20 = vadd.f32 %v1099_v19, %v1091_v18 }
0x165d   :  { %1511 = vtanh.f32 %v1101_v20 }
0x166a   :  { %v1512_v28 = vpop.eup %1511 }
0x166b   :  { %1104 = vrot.lane.b32.xlu1 %v1512_v28, %s1585_s0 }
0x16dd   :  { %v1105_v30 = vpop.permute.xlu1 %1104 }
0x16de   :  { %v1107_v31 = vmul.f32 %v1510_v13, %v1105_v30 }
0x16e0   :  { %1120 = vrot.lane.b32.xlu0 %v1107_v31, %s1586_s3 }
0x1752   :  { %v1121_v33 = vpop.permute.xlu0 %1120 }
0x1753   :  { %1452 = vmatmul.mubr.msk.f32.vlgmr.msra.gmra.mxu1 %vm301_vm3, %v1121_v33 }
0x1813   :  { %v1190_v35 = vpop.f32.mrf.mxu1 }
0x1814   :  { %v1191_v36 = vadd.f32 %v1240_v34, %v1190_v35 }
0x1815   :  { %v1453_v23 = vpop.f32.mrf.mxu1 }
0x1816   :  { %1194 = vst [vmem:[%s1813_s5] sm:$0xff] %v1191_v36 }
0x1817   :  { %1199 = vsyncpa [#allocation3], 1 }
0x1818   :  { %1200 = vsyncpa [#allocation5], 1 }

</bundles_post_ra>
